<compile_context>
chip_gen: v6e
topology: v6e:2x2x1
jax: 0.10.0
libtpu: 0.0.40
codegen_flags: <defaults>
</compile_context>

<pallas_src>
import numpy as np
import jax
import jax.numpy as jnp
from jax.experimental import pallas as pl
from jax.experimental.pallas import tpu as pltpu

B = 2
C_IN = 4                       # in_channels
C_GATE = 8                     # gating_channels
C_INTER = C_IN // 2            # inter_channels = in_channels // 2 = 2
H = W = 16
SUB = 2                        # sub_sample_factor
HS, WS = H // SUB, W // SUB    # theta_x spatial size (8, 8)
HG, WG = 4, 4                  # gating-signal spatial size
EPS = 1e-5                     # BatchNorm eps

NX = H * W                     # 256
NS = HS * WS                   # 64
NG = HG * WG                   # 16
LX = B * NX                    # 512  lane width of x / att / y / z
LS = B * NS                    # 128  lane width of the theta grid
LG = B * NG                    # 32   lane width of the gating grid

XIN_ROWS = 32                  # rows 0:16 x_sd | 16:20 x | 24:32 g   (all sublane-aligned starts)
U_ROWS = LS + LG               # rows 0:128 U_x (block-diag) | 128:160 U_phi (block-diag)

# single-vreg (8, 128) packed-parameter column layout (row axis = channels)
_PC_WTP0, _PC_WTP1 = 0, C_IN * SUB * SUB + C_GATE   # cols 0:24, rows 0:2  -> [w_theta | w_phi]
_PC_WW0, _PC_WW1 = 24, 28      # w_w (4, 4)
_PC_WPSI = 28                  # rows 0:2
_PC_BPHI = 29                  # rows 0:2
_PC_BPSI = 30                  # row 0
_PC_GAMMA = 31                 # rows 0:4
_PC_BETA = 32                  # rows 0:4


def bilinear_matrix(out_size, in_size):
    # per-axis weights matching torch F.interpolate(mode='bilinear', align_corners=False)
    # (the provided module calls F.interpolate without align_corners -> False)
    M = np.zeros((out_size, in_size), dtype=np.float32)
    scale = in_size / out_size
    for i in range(out_size):
        src = max((i + 0.5) * scale - 0.5, 0.0)
        i0 = min(int(np.floor(src)), in_size - 1)
        i1 = min(i0 + 1, in_size - 1)
        lam = src - i0
        M[i, i0] += 1.0 - lam
        M[i, i1] += lam
    return M


def _bilinear_block_diag():
    # batch sits on the lane axis -> bilinear upsamples become block-diagonal matmuls
    u_phi_t = np.kron(bilinear_matrix(HS, HG), bilinear_matrix(WS, WG)).T   # (16, 64)
    u_x_t = np.kron(bilinear_matrix(H, HS), bilinear_matrix(W, WS)).T       # (64, 256)
    u = np.zeros((U_ROWS, LX), np.float32)
    for b in range(B):
        u[b * NS:(b + 1) * NS, b * NX:(b + 1) * NX] = u_x_t                 # theta-grid -> x-grid
        u[LS + b * NG:LS + (b + 1) * NG, b * NS:(b + 1) * NS] = u_phi_t     # g-grid -> theta-grid
    return u


# ------------------------------ Pallas kernel -------------------------------

def _fused_grid_attention_kernel(xin_ref, u_ref, p_ref, wy_ref, att_ref):
    # parameters: one vreg load, then static VALUE slices (no masked per-param VMEM loads)
    p = p_ref[...]                                          # (8, 128)
    w_tp = p[0:C_INTER, _PC_WTP0:_PC_WTP1]                  # (2, 24)  [w_theta | w_phi]
    w_w = p[0:C_IN, _PC_WW0:_PC_WW1]                        # (4, 4)
    w_psi = p[0:C_INTER, _PC_WPSI:_PC_WPSI + 1]             # (2, 1)
    b_phi = p[0:C_INTER, _PC_BPHI:_PC_BPHI + 1]             # (2, 1)
    b_psi = p[0:1, _PC_BPSI:_PC_BPSI + 1]                   # (1, 1)
    gamma = p[0:C_IN, _PC_GAMMA:_PC_GAMMA + 1]              # (4, 1)
    beta = p[0:C_IN, _PC_BETA:_PC_BETA + 1]                 # (4, 1)

    x_sd = xin_ref[0:C_IN * SUB * SUB, 0:LS]                # (16, 128) space-to-depth patches
    x = xin_ref[16:16 + C_IN, :]                            # (4, 512)  x, batch on lanes
    g = xin_ref[24:24 + C_GATE, 0:LG]                       # (8, 32)   gating signal
    u_x = u_ref[0:LS, :]                                    # (128, 512) block-diag bilinear
    u_phi = u_ref[LS:LS + LG, 0:LS]                         # (32, 128)  block-diag bilinear

    # phi 1x1 conv fused with its upsample: bilinear weights per output sum to 1, so the conv
    # bias commutes with the upsample and is added once after the K-concat matmul below.
    g_up = jnp.dot(g, u_phi, preferred_element_type=jnp.float32)               # (8, 128)

    # theta (2x2/s2 conv) + phi fused into ONE K-concatenated matmul over both batches
    k_in = jnp.concatenate([x_sd, g_up], axis=0)                                # (24, 128)
    f = jnp.maximum(jnp.dot(w_tp, k_in, preferred_element_type=jnp.float32) + b_phi, 0.0)

    # psi 1x1 conv to a single channel: VPU multiply + 2-row sublane reduce (off the MXU),
    # then an exact sigmoid (EUP exp + f32 divide).
    psi = jnp.sum(f * w_psi, axis=0, keepdims=True) + b_psi                     # (1, 128)
    sig = 1.0 / (1.0 + jnp.exp(-psi))

    # bilinear upsample of the attention map to the x grid: one lane-dense (1, 512) matmul
    att = jnp.dot(sig, u_x, preferred_element_type=jnp.float32)                 # (1, 512)
    att_ref[...] = att

    # gate + W 1x1 conv.  W's conv bias is omitted: training-mode BatchNorm subtracts the
    # per-channel batch mean, so a constant pre-BN bias cancels exactly.
    y = att * x                                                                 # (4, 512)
    z = jnp.dot(w_w, y, preferred_element_type=jnp.float32)                     # (4, 512)

    # fused BatchNorm2d, training mode: biased batch statistics over B*H*W per channel.
    # TODO(synk): running_mean / running_var state updates are not produced (pure forward).
    n_inv = 1.0 / float(B * H * W)
    mean = jnp.sum(z, axis=1, keepdims=True) * n_inv                            # (4, 1)
    zc = z - mean
    var = jnp.sum(zc * zc, axis=1, keepdims=True) * n_inv                       # (4, 1)
    wy_ref[...] = zc * (gamma * jax.lax.rsqrt(var + EPS)) + beta                # (4, 512)


# -------------------------------- wrapper ------------------------------------

def grid_attention_forward(x, g, packed_params):
    """x: (B, C_IN, H, W) NCHW; g: (B, C_GATE, HG, WG) NCHW; packed_params: (8, 128)."""
    # channels-first lane packing: batch goes on the lane axis (lane = b*HW + h*W + w)
    x_flat = jnp.transpose(x, (1, 0, 2, 3)).reshape(C_IN, LX)                   # (4, 512)
    # space-to-depth for the 2x2/stride-2 theta conv; row order (c, kh, kw) matches w_theta
    x_sd = jnp.transpose(x.reshape(B, C_IN, HS, SUB, WS, SUB),
                         (1, 3, 5, 0, 2, 4)).reshape(C_IN * SUB * SUB, LS)       # (16, 128)
    g_flat = jnp.transpose(g, (1, 0, 2, 3)).reshape(C_GATE, LG)                 # (8, 32)

    # one packed data operand (one DMA instead of three), sublane-aligned sections
    xin = jnp.zeros((XIN_ROWS, LX), jnp.float32)
    xin = xin.at[0:C_IN * SUB * SUB, 0:LS].set(x_sd)
    xin = xin.at[16:16 + C_IN, :].set(x_flat)
    xin = xin.at[24:24 + C_GATE, 0:LG].set(g_flat)

    # both bilinear matrices (block-diagonal over the batch) in one constant operand
    u_all = jnp.asarray(_bilinear_block_diag())

    wy_flat, att_flat = pl.pallas_call(
        _fused_grid_attention_kernel,
        out_shape=(jax.ShapeDtypeStruct((C_IN, LX), jnp.float32),
                   jax.ShapeDtypeStruct((1, LX), jnp.float32)),
        in_specs=[pl.BlockSpec(memory_space=pltpu.MemorySpace.VMEM)] * 3,
        out_specs=(pl.BlockSpec(memory_space=pltpu.MemorySpace.VMEM),
                   pl.BlockSpec(memory_space=pltpu.MemorySpace.VMEM)),
    )(xin, u_all, packed_params)

    w_y = jnp.transpose(wy_flat.reshape(C_IN, B, H, W), (1, 0, 2, 3))
    sigm_psi_f = jnp.transpose(att_flat.reshape(1, B, H, W), (1, 0, 2, 3))
    return w_y, sigm_psi_f


# --------------------------- deterministic params ----------------------------

def init_params(key):
    ks = jax.random.split(key, 8)
    # kaiming_normal(fan_in, a=0): std = sqrt(2 / fan_in); channels-first weight layouts
    w_theta = (jax.random.normal(ks[0], (C_INTER, C_IN, SUB, SUB)) *
               (2.0 / (C_IN * SUB * SUB)) ** 0.5).reshape(C_INTER, C_IN * SUB * SUB)   # (2, 16)
    w_phi = jax.random.normal(ks[1], (C_INTER, C_GATE)) * (2.0 / C_GATE) ** 0.5        # (2, 8)
    b_phi = jax.random.normal(ks[2], (C_INTER,)) * 0.1
    w_psi = jax.random.normal(ks[3], (1, C_INTER)) * (2.0 / C_INTER) ** 0.5            # (1, 2)
    b_psi = jax.random.normal(ks[4], (1,)) * 0.1
    w_w = jax.random.normal(ks[5], (C_IN, C_IN)) * (2.0 / C_IN) ** 0.5                 # (4, 4)
    # W's conv bias is drawn for determinism but unused: training-mode BN cancels it exactly.
    _b_w = jax.random.normal(ks[6], (C_IN,)) * 0.1
    gamma = 1.0 + 0.02 * jax.random.normal(ks[7], (C_IN,))   # BatchNorm weight ~ N(1, 0.02)
    beta = jnp.zeros((C_IN,))                                # BatchNorm bias = 0

    p = jnp.zeros((8, 128), jnp.float32)
    p = p.at[0:C_INTER, 0:C_IN * SUB * SUB].set(w_theta)
    p = p.at[0:C_INTER, C_IN * SUB * SUB:_PC_WTP1].set(w_phi)
    p = p.at[0:C_IN, _PC_WW0:_PC_WW1].set(w_w)
    p = p.at[0:C_INTER, _PC_WPSI].set(w_psi[0])
    p = p.at[0:C_INTER, _PC_BPHI].set(b_phi)
    p = p.at[0, _PC_BPSI].set(b_psi[0])
    p = p.at[0:C_IN, _PC_GAMMA].set(gamma)
    p = p.at[0:C_IN, _PC_BETA].set(beta)
    return p.astype(jnp.float32)


# ------------------------- pure-JAX reference (check) -------------------------

def _reference_forward(x, g, packed_params):
    p = packed_params
    w_theta = p[0:C_INTER, 0:C_IN * SUB * SUB].reshape(C_INTER, C_IN, SUB, SUB)
    w_phi = p[0:C_INTER, C_IN * SUB * SUB:_PC_WTP1]
    w_w = p[0:C_IN, _PC_WW0:_PC_WW1]
    w_psi = p[0:C_INTER, _PC_WPSI]
    b_phi = p[0:C_INTER, _PC_BPHI]
    b_psi = p[0, _PC_BPSI]
    gamma = p[0:C_IN, _PC_GAMMA]
    beta = p[0:C_IN, _PC_BETA]

    theta = jnp.einsum('bchpwq,ocpq->bohw',
                       x.reshape(B, C_IN, HS, SUB, WS, SUB), w_theta)
    phi = jnp.einsum('oc,bchw->bohw', w_phi, g) + b_phi[None, :, None, None]
    mh_p, mw_p = jnp.asarray(bilinear_matrix(HS, HG)), jnp.asarray(bilinear_matrix(WS, WG))
    phi_up = jnp.einsum('Hh,bohw,Ww->boHW', mh_p, phi, mw_p)
    f = jnp.maximum(theta + phi_up, 0.0)
    psi = jnp.einsum('o,bohw->bhw', w_psi, f)[:, None] + b_psi
    sig = jax.nn.sigmoid(psi)
    mh_x, mw_x = jnp.asarray(bilinear_matrix(H, HS)), jnp.asarray(bilinear_matrix(W, WS))
    att = jnp.einsum('Hh,bohw,Ww->boHW', mh_x, sig, mw_x)
    y = att * x
    z = jnp.einsum('oc,bchw->bohw', w_w, y)   # conv bias omitted: cancelled by training-mode BN
    mean = jnp.mean(z, axis=(0, 2, 3), keepdims=True)
    var = jnp.mean((z - mean) ** 2, axis=(0, 2, 3), keepdims=True)
    wy = ((z - mean) * jax.lax.rsqrt(var + EPS) * gamma[None, :, None, None]
          + beta[None, :, None, None])
    return wy, att


if __name__ == "__main__":
    kx, kg = jax.random.split(jax.random.PRNGKey(0))
    x = jax.random.normal(kx, (B, C_IN, H, W), jnp.float32)
    g = jax.random.normal(kg, (B, C_GATE, HG, WG), jnp.float32)
    params = init_params(jax.random.PRNGKey(42))

    w_y, sigm_psi_f = jax.jit(grid_attention_forward)(x, g, params)
    jax.block_until_ready((w_y, sigm_psi_f))
    assert w_y.shape == (B, C_IN, H, W)
    assert sigm_psi_f.shape == (B, 1, H, W)
    assert bool(jnp.all(jnp.isfinite(w_y))) and bool(jnp.all(jnp.isfinite(sigm_psi_f)))

    # correctness vs. a pure-JAX reference (tolerance covers default bf16 MXU passes)
    wy_ref, att_ref = _reference_forward(x, g, params)
    assert bool(jnp.allclose(w_y, wy_ref, rtol=5e-2, atol=5e-2)), \
        float(jnp.max(jnp.abs(w_y - wy_ref)))
    assert bool(jnp.allclose(sigm_psi_f, att_ref, rtol=5e-2, atol=5e-2)), \
        float(jnp.max(jnp.abs(sigm_psi_f - att_ref)))
    print("KERNEL_OK")
</pallas_src>

<mosaic_0001>
module attributes {stable_mosaic.version = 11 : i64} {
  func.func @_fused_grid_attention_kernel(%arg0: memref<32x512xf32, #tpu.memory_space<vmem>>, %arg1: memref<160x512xf32, #tpu.memory_space<vmem>>, %arg2: memref<8x128xf32, #tpu.memory_space<vmem>>, %arg3: memref<4x512xf32, #tpu.memory_space<vmem>>, %arg4: memref<1x512xf32, #tpu.memory_space<vmem>>) attributes {dimension_semantics = [], scalar_prefetch = 0 : i64, scratch_operands = 0 : i64, tpu.core_type = #tpu.core_type<tc>} {
    %c0 = arith.constant 0 : index
    %c0_0 = arith.constant 0 : index
    %0 = vector.load %arg2[%c0, %c0_0] : memref<8x128xf32, #tpu.memory_space<vmem>>, vector<8x128xf32>
    %1 = vector.extract_strided_slice %0 {offsets = [0, 0], sizes = [2, 24], strides = [1, 1]} : vector<8x128xf32> to vector<2x24xf32>
    %2 = vector.extract_strided_slice %0 {offsets = [0, 24], sizes = [4, 4], strides = [1, 1]} : vector<8x128xf32> to vector<4x4xf32>
    %3 = vector.extract_strided_slice %0 {offsets = [0, 28], sizes = [2, 1], strides = [1, 1]} : vector<8x128xf32> to vector<2x1xf32>
    %4 = vector.extract_strided_slice %0 {offsets = [0, 29], sizes = [2, 1], strides = [1, 1]} : vector<8x128xf32> to vector<2x1xf32>
    %5 = vector.extract_strided_slice %0 {offsets = [0, 30], sizes = [1, 1], strides = [1, 1]} : vector<8x128xf32> to vector<1x1xf32>
    %6 = vector.extract_strided_slice %0 {offsets = [0, 31], sizes = [4, 1], strides = [1, 1]} : vector<8x128xf32> to vector<4x1xf32>
    %7 = vector.extract_strided_slice %0 {offsets = [0, 32], sizes = [4, 1], strides = [1, 1]} : vector<8x128xf32> to vector<4x1xf32>
    %c0_1 = arith.constant 0 : index
    %c0_2 = arith.constant 0 : index
    %8 = vector.load %arg0[%c0_1, %c0_2] : memref<32x512xf32, #tpu.memory_space<vmem>>, vector<16x128xf32>
    %c16 = arith.constant 16 : index
    %c0_3 = arith.constant 0 : index
    %9 = vector.load %arg0[%c16, %c0_3] : memref<32x512xf32, #tpu.memory_space<vmem>>, vector<4x512xf32>
    %c24 = arith.constant 24 : index
    %c0_4 = arith.constant 0 : index
    %10 = vector.load %arg0[%c24, %c0_4] : memref<32x512xf32, #tpu.memory_space<vmem>>, vector<8x32xf32>
    %c0_5 = arith.constant 0 : index
    %c0_6 = arith.constant 0 : index
    %11 = vector.load %arg1[%c0_5, %c0_6] : memref<160x512xf32, #tpu.memory_space<vmem>>, vector<128x512xf32>
    %c128 = arith.constant 128 : index
    %c0_7 = arith.constant 0 : index
    %12 = vector.load %arg1[%c128, %c0_7] : memref<160x512xf32, #tpu.memory_space<vmem>>, vector<32x128xf32>
    %cst = arith.constant dense<0.000000e+00> : vector<8x128xf32>
    %13 = tpu.matmul %10, %12, %cst {dimension_numbers = #tpu.dot_dimension_numbers<[1], [0], [0], [1], [0, 0, 1, 1], [], []>} : vector<8x32xf32>, vector<32x128xf32>, vector<8x128xf32> -> vector<8x128xf32>
    %14 = tpu.concatenate %8, %13 in 0 : vector<16x128xf32>, vector<8x128xf32> -> vector<24x128xf32>
    %cst_8 = arith.constant dense<0.000000e+00> : vector<2x128xf32>
    %15 = tpu.matmul %1, %14, %cst_8 {dimension_numbers = #tpu.dot_dimension_numbers<[1], [0], [0], [1], [0, 0, 1, 1], [], []>} : vector<2x24xf32>, vector<24x128xf32>, vector<2x128xf32> -> vector<2x128xf32>
    %16 = vector.broadcast %4 : vector<2x1xf32> to vector<2x128xf32>
    %17 = arith.addf %15, %16 : vector<2x128xf32>
    %cst_9 = arith.constant 0.000000e+00 : f32
    %18 = vector.broadcast %cst_9 : f32 to vector<2x128xf32>
    %19 = arith.maximumf %17, %18 : vector<2x128xf32>
    %20 = vector.broadcast %3 : vector<2x1xf32> to vector<2x128xf32>
    %21 = arith.mulf %19, %20 : vector<2x128xf32>
    %cst_10 = arith.constant dense<0.000000e+00> : vector<128xf32>
    %22 = vector.multi_reduction <add>, %21, %cst_10 [0] : vector<2x128xf32> to vector<128xf32>
    %23 = vector.shape_cast %22 : vector<128xf32> to vector<1x128xf32>
    %24 = vector.broadcast %5 : vector<1x1xf32> to vector<1x128xf32>
    %25 = arith.addf %23, %24 : vector<1x128xf32>
    %cst_11 = arith.constant 0.000000e+00 : f32
    %26 = vector.broadcast %cst_11 : f32 to vector<1x128xf32>
    %27 = arith.subf %26, %25 : vector<1x128xf32>
    %28 = math.exp %27 : vector<1x128xf32>
    %cst_12 = arith.constant 1.000000e+00 : f32
    %29 = vector.broadcast %cst_12 : f32 to vector<1x128xf32>
    %30 = arith.addf %29, %28 : vector<1x128xf32>
    %cst_13 = arith.constant 1.000000e+00 : f32
    %31 = vector.broadcast %cst_13 : f32 to vector<1x128xf32>
    %32 = arith.divf %31, %30 : vector<1x128xf32>
    %cst_14 = arith.constant dense<0.000000e+00> : vector<1x512xf32>
    %33 = tpu.matmul %32, %11, %cst_14 {dimension_numbers = #tpu.dot_dimension_numbers<[1], [0], [0], [1], [0, 0, 1, 1], [], []>} : vector<1x128xf32>, vector<128x512xf32>, vector<1x512xf32> -> vector<1x512xf32>
    %c0_15 = arith.constant 0 : index
    %c0_16 = arith.constant 0 : index
    %34 = vector.load %arg4[%c0_15, %c0_16] : memref<1x512xf32, #tpu.memory_space<vmem>>, vector<1x512xf32>
    tpu.vector_store %arg4[%c0_15, %c0_16], %33 {strides = array<i32>} : memref<1x512xf32, #tpu.memory_space<vmem>>, vector<1x512xf32>,
    %35 = vector.broadcast %33 : vector<1x512xf32> to vector<4x512xf32>
    %36 = arith.mulf %35, %9 : vector<4x512xf32>
    %cst_17 = arith.constant dense<0.000000e+00> : vector<4x512xf32>
    %37 = tpu.matmul %2, %36, %cst_17 {dimension_numbers = #tpu.dot_dimension_numbers<[1], [0], [0], [1], [0, 0, 1, 1], [], []>} : vector<4x4xf32>, vector<4x512xf32>, vector<4x512xf32> -> vector<4x512xf32>
    %cst_18 = arith.constant dense<0.000000e+00> : vector<4xf32>
    %38 = vector.multi_reduction <add>, %37, %cst_18 [1] : vector<4x512xf32> to vector<4xf32>
    %39 = vector.shape_cast %38 : vector<4xf32> to vector<4x1xf32>
    %cst_19 = arith.constant 0.001953125 : f32
    %40 = vector.broadcast %cst_19 : f32 to vector<4x1xf32>
    %41 = arith.mulf %39, %40 : vector<4x1xf32>
    %42 = vector.broadcast %41 : vector<4x1xf32> to vector<4x512xf32>
    %43 = arith.subf %37, %42 : vector<4x512xf32>
    %44 = arith.mulf %43, %43 : vector<4x512xf32>
    %cst_20 = arith.constant dense<0.000000e+00> : vector<4xf32>
    %45 = vector.multi_reduction <add>, %44, %cst_20 [1] : vector<4x512xf32> to vector<4xf32>
    %46 = vector.shape_cast %45 : vector<4xf32> to vector<4x1xf32>
    %cst_21 = arith.constant 0.001953125 : f32
    %47 = vector.broadcast %cst_21 : f32 to vector<4x1xf32>
    %48 = arith.mulf %46, %47 : vector<4x1xf32>
    %cst_22 = arith.constant 9.99999974E-6 : f32
    %49 = vector.broadcast %cst_22 : f32 to vector<4x1xf32>
    %50 = arith.addf %48, %49 : vector<4x1xf32>
    %51 = math.rsqrt %50 : vector<4x1xf32>
    %52 = arith.mulf %6, %51 : vector<4x1xf32>
    %53 = vector.broadcast %52 : vector<4x1xf32> to vector<4x512xf32>
    %54 = arith.mulf %43, %53 : vector<4x512xf32>
    %55 = vector.broadcast %7 : vector<4x1xf32> to vector<4x512xf32>
    %56 = arith.addf %54, %55 : vector<4x512xf32>
    %c0_23 = arith.constant 0 : index
    %c0_24 = arith.constant 0 : index
    %57 = vector.load %arg3[%c0_23, %c0_24] : memref<4x512xf32, #tpu.memory_space<vmem>>, vector<4x512xf32>
    tpu.vector_store %arg3[%c0_23, %c0_24], %56 {strides = array<i32>} : memref<4x512xf32, #tpu.memory_space<vmem>>, vector<4x512xf32>,
    return
  }
}

</mosaic_0001>

<bundles_post_ra>
// kernel: grid_attention_forward.1
= control target key start
LH: loop header
LB: loop body
LE: loop exit
PB: predicated region body
PF: predicated region fallthrough
CT: control target
= control target key end

     0   :  { %v749_v0 = vmov 0.0   ;;  %vm750_vm0 = vmmov 0   ;;  %vm92_vm1 = vcmask 261120   ;;  %v751_v7 = vmov 29   ;;  %s754_s24 = smov 104   ;;  %s1054_s1 = inlined_call_operand.vmem [shape: f32[160,512], index: 1, kind: input, shape index: {}]   ;;  %s1055_s0 = inlined_call_operand.vmem [shape: f32[32,512], index: 0, kind: input, shape index: {}]   ;;  %s1056_s2 = inlined_call_operand.vmem [shape: f32[8,128], index: 2, kind: input, shape index: {}]   ;;  %s1057_s4 = inlined_call_operand.vmem [shape: f32[1,512], index: 4, kind: output, shape index: {1}]   ;;  %s1058_s3 = inlined_call_operand.vmem [shape: f32[4,512], index: 3, kind: output, shape index: {0}]  }
   0x1   :  { %708 = vmatprep.subr.mxu0 %v749_v0  ;;  %v91_v1 = vld [vmem:[%s1054_s1 + $0x260] sm:$0xff]  ;;  %716 = vmatprep.mubr.msk.f32.mxu0 %vm750_vm0, %v749_v0  ;;  %v752_v8 = vmov 30   ;;  %v753_v9 = vmov 28   ;;  %vm171_vm2 = vcmask 195584   ;;  %v85_v14 = vld [vmem:[%s1054_s1 + $0x1e8] sm:$0xff]  ;;  %v87_v15 = vld [vmem:[%s1054_s1 + $0x1f8] sm:$0xff] }
   0x2   :  { %v90_v2 = vld [vmem:[%s1054_s1 + $0x240] sm:$0xff]  ;;  %709 = vmatpush3.msra.mxu0 %v91_v1  ;;  %719 = vmatprep.subr.mxu1 %v749_v0  ;;  %v86_v17 = vld [vmem:[%s1054_s1 + $0x1f0] sm:$0xff]  ;;  %v81_v18 = vld [vmem:[%s1054_s1 + $0x1c8] sm:$0xff]  ;;  %vm250_vm3 = vcmask 1041408   ;;  %vm470_vm4 = vcmask 1043456   ;;  %vm467_vm5 = vcmask 31744  }
   0x3   :  { %710 = vmatprep.subr.mxu0 %v749_v0  ;;  %v89_v3 = vld [vmem:[%s1054_s1 + $0x220] sm:$0xff]  ;;  %725 = vmatprep.mubr.msk.f32.mxu1 %vm750_vm0, %v749_v0  ;;  %v83_v19 = vld [vmem:[%s1054_s1 + $0x1d8] sm:$0xff]  ;;  %v82_v21 = vld [vmem:[%s1054_s1 + $0x1d0] sm:$0xff] }
   0x4   :  { %711 = vmatpush3.msra.mxu0 %v90_v2  ;;  %v88_v4 = vld [vmem:[%s1054_s1 + $0x200] sm:$0xff]  ;;  %737 = vset.pattern.permute.xlu0 %v751_v7  ;;  %v77_v22 = vld [vmem:[%s1054_s1 + $0x1a8] sm:$0xff]  ;;  %v79_v23 = vld [vmem:[%s1054_s1 + $0x1b8] sm:$0xff] }
   0x5   :  { %712 = vmatprep.subr.mxu0 %v749_v0  ;;  %v23_v5 = vld [vmem:[%s1055_s0 + $0x60] sm:$0xff]  ;;  %739 = vset.pattern.permute.xlu1 %v752_v8  ;;  %v78_v25 = vld [vmem:[%s1054_s1 + $0x1b0] sm:$0xff]  ;;  %v73_v26 = vld [vmem:[%s1054_s1 + $0x188] sm:$0xff] }
   0x6   :  { %713 = vmatpush3.msra.mxu0 %v89_v3  ;;  %v809_v6 = vld [vmem:[%s1056_s2] sm:$0xff]  ;;  %v75_v27 = vld [vmem:[%s1054_s1 + $0x198] sm:$0xff]  ;;  %v74_v29 = vld [vmem:[%s1054_s1 + $0x190] sm:$0xff] }
   0x7   :  { %714 = vmatprep.subr.mxu0 %v749_v0  ;;  %168 = vperm.xlu0 %737, %v809_v6   ;;  %v18_v11 = vld [vmem:[%s1055_s0 + $0x20] sm:$0xff]  ;;  %v69_v30 = vld [vmem:[%s1054_s1 + $0x168] sm:$0xff]  ;;  %v71_v31 = vld [vmem:[%s1054_s1 + $0x178] sm:$0xff] }
   0x8   :  { %715 = vmatpush3.msra.mxu0 %v88_v4  ;;  %259 = vperm.xlu1 %739, %v809_v6   ;;  %v17_v13 = vld [vmem:[%s1055_s0] sm:$0xff]  ;;  %v70_v33 = vld [vmem:[%s1054_s1 + $0x170] sm:$0xff]  ;;  %v65_v34 = vld [vmem:[%s1054_s1 + $0x148] sm:$0xff] }
   0x9   :  { %717 = vmatmul.mubr.msk.f32.vlgmr.msra.gmra.mxu0 %vm92_vm1, %v23_v5  ;;  %340 = vmatprep.subr.mxu0 %v87_v15  ;;  %v84_v16 = vld [vmem:[%s1054_s1 + $0x1e0] sm:$0xff]  ;;  %v67_v35 = vld [vmem:[%s1054_s1 + $0x158] sm:$0xff]  ;;  %v66_v37 = vld [vmem:[%s1054_s1 + $0x150] sm:$0xff] }
   0xa   :  { %404 = vmatprep.mubr.f32.mxu0 %v749_v0  ;;  %341 = vmatpush1.msra.mxu0 %v86_v17  ;;  %v80_v20 = vld [vmem:[%s1054_s1 + $0x1c0] sm:$0xff]  ;;  %v61_v38 = vld [vmem:[%s1054_s1 + $0x128] sm:$0xff]  ;;  %v63_v39 = vld [vmem:[%s1054_s1 + $0x138] sm:$0xff] }
   0xb   :  { %738 = vset.pattern.permute.xlu0 %v753_v9  ;;  %342 = vmatprep.subr.mxu0 %v83_v19  ;;  %v76_v24 = vld [vmem:[%s1054_s1 + $0x1a0] sm:$0xff]  ;;  %v62_v41 = vld [vmem:[%s1054_s1 + $0x130] sm:$0xff]  ;;  %v57_v42 = vld [vmem:[%s1054_s1 + $0x108] sm:$0xff] }
   0xc   :  { %246 = vperm.xlu0 %738, %v809_v6   ;;  %343 = vmatpush1.msra.mxu0 %v82_v21  ;;  %v72_v28 = vld [vmem:[%s1054_s1 + $0x180] sm:$0xff]  ;;  %v59_v43 = vld [vmem:[%s1054_s1 + $0x118] sm:$0xff]  ;;  %v58_v45 = vld [vmem:[%s1054_s1 + $0x110] sm:$0xff] }
   0xd   :  { %344 = vmatprep.subr.mxu0 %v79_v23  ;;  %v68_v32 = vld [vmem:[%s1054_s1 + $0x160] sm:$0xff]  ;;  %v53_v46 = vld [vmem:[%s1054_s1 + $0xe8] sm:$0xff]  ;;  %v55_v47 = vld [vmem:[%s1054_s1 + $0xf8] sm:$0xff]  ;;  %465 = vrot.lane.b32.xlu1 %v809_v6, %s754_s24 }
   0xe   :  { %345 = vmatpush1.msra.mxu0 %v78_v25  ;;  %v64_v36 = vld [vmem:[%s1054_s1 + $0x140] sm:$0xff]  ;;  %v54_v49 = vld [vmem:[%s1054_s1 + $0xf0] sm:$0xff]  ;;  %v49_v50 = vld [vmem:[%s1054_s1 + $0xc8] sm:$0xff] }
   0xf   :  { %346 = vmatprep.subr.mxu0 %v75_v27  ;;  %v60_v40 = vld [vmem:[%s1054_s1 + $0x120] sm:$0xff]  ;;  %v51_v51 = vld [vmem:[%s1054_s1 + $0xd8] sm:$0xff]  ;;  %v50_v53 = vld [vmem:[%s1054_s1 + $0xd0] sm:$0xff] }
  0x10   :  { %347 = vmatpush1.msra.mxu0 %v74_v29  ;;  %v56_v44 = vld [vmem:[%s1054_s1 + $0x100] sm:$0xff]  ;;  %v45_v54 = vld [vmem:[%s1054_s1 + $0xa8] sm:$0xff]  ;;  %v47_v55 = vld [vmem:[%s1054_s1 + $0xb8] sm:$0xff] }
  0x11   :  { %348 = vmatprep.subr.mxu0 %v71_v31  ;;  %v52_v48 = vld [vmem:[%s1054_s1 + $0xe0] sm:$0xff]  ;;  %v46_v57 = vld [vmem:[%s1054_s1 + $0xb0] sm:$0xff]  ;;  %v41_v58 = vld [vmem:[%s1054_s1 + $0x88] sm:$0xff] }
  0x12   :  { %349 = vmatpush1.msra.mxu0 %v70_v33  ;;  %v48_v52 = vld [vmem:[%s1054_s1 + $0xc0] sm:$0xff]  ;;  %v43_v59 = vld [vmem:[%s1054_s1 + $0x98] sm:$0xff]  ;;  %v42_v61 = vld [vmem:[%s1054_s1 + $0x90] sm:$0xff] }
  0x13   :  { %350 = vmatprep.subr.mxu0 %v67_v35  ;;  %v44_v56 = vld [vmem:[%s1054_s1 + $0xa0] sm:$0xff]  ;;  %v37_v62 = vld [vmem:[%s1054_s1 + $0x68] sm:$0xff]  ;;  %v39_v63 = vld [vmem:[%s1054_s1 + $0x78] sm:$0xff] }
  0x14   :  { %351 = vmatpush1.msra.mxu0 %v66_v37  ;;  %v40_v60 = vld [vmem:[%s1054_s1 + $0x80] sm:$0xff]  ;;  %v38_v2 = vld [vmem:[%s1054_s1 + $0x70] sm:$0xff]  ;;  %v33_v3 = vld [vmem:[%s1054_s1 + $0x48] sm:$0xff]  ;;  %v420_v37 = vlaneseq }
  0x15   :  { %352 = vmatprep.subr.mxu0 %v63_v39  ;;  %v36_v1 = vld [vmem:[%s1054_s1 + $0x60] sm:$0xff]  ;;  %v35_v4 = vld [vmem:[%s1054_s1 + $0x58] sm:$0xff]  ;;  %v34_v7 = vld [vmem:[%s1054_s1 + $0x50] sm:$0xff] }
  0x16   :  { %353 = vmatpush1.msra.mxu0 %v62_v41  ;;  %v32_v5 = vld [vmem:[%s1054_s1 + $0x40] sm:$0xff]  ;;  %v29_v8 = vld [vmem:[%s1054_s1 + $0x28] sm:$0xff]  ;;  %v31_v9 = vld [vmem:[%s1054_s1 + $0x38] sm:$0xff]  ;;  %vm442_vm6 = vcmp.lt.s32.totalorder %v420_v37, 512 }
  0x17   :  { %354 = vmatprep.subr.mxu0 %v59_v43  ;;  %v26_v15 = vld [vmem:[%s1054_s1 + $0x10] sm:$0xff] }
  0x18   :  { %355 = vmatpush1.msra.mxu0 %v58_v45 }
  0x19   :  { %356 = vmatprep.subr.mxu0 %v55_v47  ;;  %v20_v47 = vld [vmem:[%s1055_s0 + $0x48] sm:$0xf] }
  0x1a   :  { %357 = vmatpush1.msra.mxu0 %v54_v49 }
  0x1b   :  { %358 = vmatprep.subr.mxu0 %v51_v51 }
  0x1c   :  { %359 = vmatpush1.msra.mxu0 %v50_v53  ;;  %v22_v53 = vld [vmem:[%s1055_s0 + $0x58] sm:$0xf] }
  0x1d   :  { %360 = vmatprep.subr.mxu0 %v47_v55 }
  0x1e   :  { %361 = vmatpush1.msra.mxu0 %v46_v57 }
  0x1f   :  { %362 = vmatprep.subr.mxu0 %v43_v59 }
  0x20   :  { %363 = vmatpush1.msra.mxu0 %v42_v61 }
  0x21   :  { %364 = vmatprep.subr.mxu0 %v39_v63 }
  0x22   :  { %365 = vmatpush1.msra.mxu0 %v38_v2 }
  0x23   :  { %366 = vmatprep.subr.mxu0 %v35_v4 }
  0x24   :  { %367 = vmatpush1.msra.mxu0 %v34_v7 }
  0x25   :  { %368 = vmatprep.subr.mxu0 %v31_v9 }
  0x83   :  { %v260_v29 = vpop.permute.xlu1 %259 }
  0xc9   :  { %v162_v10 = vpop.f32.mrf.mxu0 }
  0xca   :  { %720 = vmatpush3.msra.mxu1 %v162_v10  ;;  %v28_v10 = vld [vmem:[%s1054_s1 + $0x20] sm:$0xff] }
  0xcb   :  { %v718_v12 = vpop.f32.mrf.mxu0  ;;  %721 = vmatprep.subr.mxu1 %v749_v0 }
  0xcc   :  { %722 = vmatpush3.msra.mxu1 %v18_v11  ;;  %v30_v11 = vld [vmem:[%s1054_s1 + $0x30] sm:$0xff]  ;;  %v25_v12 = vld [vmem:[%s1054_s1 + $0x8] sm:$0xff] }
  0xcd   :  { %723 = vmatprep.subr.mxu1 %v749_v0  ;;  %369 = vmatpush1.msra.mxu0 %v30_v11 }
  0xce   :  { %724 = vmatpush3.msra.mxu1 %v17_v13  ;;  %v27_v13 = vld [vmem:[%s1054_s1 + $0x18] sm:$0xff] }
  0xcf   :  { %726 = vmatmul.mubr.msk.f32.vlgmr.msra.gmra.mxu1 %vm171_vm2, %v809_v6  ;;  %269 = vmatprep.subr.mxu1 %v85_v14  ;;  %v24_v14 = vld [vmem:[%s1054_s1] sm:$0xff] }
  0xd0   :  { %333 = vmatprep.mubr.f32.mxu1 %v749_v0  ;;  %270 = vmatpush1.msra.mxu1 %v84_v16  ;;  %v169_v16 = vpop.permute.xlu0 %168 }
  0xd1   :  { %271 = vmatprep.subr.mxu1 %v81_v18  ;;  %370 = vmatprep.subr.mxu0 %v27_v13 }
  0xd2   :  { %272 = vmatpush1.msra.mxu1 %v80_v20  ;;  %371 = vmatpush1.msra.mxu0 %v26_v15 }
  0xd3   :  { %273 = vmatprep.subr.mxu1 %v77_v22 }
  0xd4   :  { %274 = vmatpush1.msra.mxu1 %v76_v24  ;;  %v247_v20 = vpop.permute.xlu0 %246 }
  0xd5   :  { %275 = vmatprep.subr.mxu1 %v73_v26 }
  0xd6   :  { %276 = vmatpush1.msra.mxu1 %v72_v28 }
  0xd7   :  { %277 = vmatprep.subr.mxu1 %v69_v30 }
  0xd8   :  { %278 = vmatpush1.msra.mxu1 %v68_v32 }
  0xd9   :  { %279 = vmatprep.subr.mxu1 %v65_v34 }
  0xda   :  { %280 = vmatpush1.msra.mxu1 %v64_v36 }
  0xdb   :  { %281 = vmatprep.subr.mxu1 %v61_v38  ;;  %v755_v38 = vmov 1966171168  }
  0xdc   :  { %282 = vmatpush1.msra.mxu1 %v60_v40  ;;  %v418_v39 = vunpack.c.l.s4 %v755_v38  ;;  %v421_v40 = vshrl.u32 %v420_v37, 7 }
  0xdd   :  { %283 = vmatprep.subr.mxu1 %v57_v42 }
  0xde   :  { %284 = vmatpush1.msra.mxu1 %v56_v44  ;;  %v419_v41 = vunpack.c.0.s8 %v418_v39  ;;  %v447_v42 = vsub.s32 0, %v421_v40 }
  0xdf   :  { %285 = vmatprep.subr.mxu1 %v53_v46 }
  0xe0   :  { %286 = vmatpush1.msra.mxu1 %v52_v48  ;;  %v422_v45 = vsub.s32 %v419_v41, %v421_v40 }
  0xe1   :  { %287 = vmatprep.subr.mxu1 %v49_v50 }
  0xe2   :  { %288 = vmatpush1.msra.mxu1 %v48_v52 }
  0xe3   :  { %289 = vmatprep.subr.mxu1 %v45_v54  ;;  %v21_v54 = vld [vmem:[%s1055_s0 + $0x50] sm:$0xf] }
  0xe4   :  { %290 = vmatpush1.msra.mxu1 %v44_v56 }
  0xe5   :  { %291 = vmatprep.subr.mxu1 %v41_v58 }
  0xe6   :  { %292 = vmatpush1.msra.mxu1 %v40_v60 }
  0xe7   :  { %293 = vmatprep.subr.mxu1 %v37_v62  ;;  %v466_v62 = vpop.permute.xlu1 %465 }
  0xe8   :  { %294 = vmatpush1.msra.mxu1 %v36_v1 }
  0xe9   :  { %295 = vmatprep.subr.mxu1 %v33_v3 }
  0xea   :  { %296 = vmatpush1.msra.mxu1 %v32_v5 }
  0xeb   :  { %297 = vmatprep.subr.mxu1 %v29_v8 }
  0xec   :  { %298 = vmatpush1.msra.mxu1 %v28_v10 }
  0xed   :  { %299 = vmatprep.subr.mxu1 %v25_v12 }
  0xee   :  { %300 = vmatpush1.msra.mxu1 %v24_v14 }
 0x18f   :  { %v240_v17 = vpop.f32.mrf.mxu1 }
 0x190   :  { %v241_v18 = vadd.f32 %v240_v17, %v169_v16 }
 0x191   :  { %v727_v19 = vpop.f32.mrf.mxu1 }
 0x192   :  { %v244_v21 = vmax.f32 %v241_v18, 0.0 }
 0x194   :  { %v249_v22 = vmul.f32 %v247_v20, %v244_v21 }
 0x196   :  { %v251_v23 = vsel %vm250_vm3, %v249_v22, 0.0 }
 0x197   :  { %v252_v24 = vrot.slane %v251_v23, 4 }
 0x199   :  { %v253_v25 = vadd.f32 %v252_v24, %v251_v23 }
 0x19b   :  { %v254_v26 = vrot.slane %v253_v25, 2 }
 0x19d   :  { %v255_v27 = vadd.f32 %v254_v26, %v253_v25 }
 0x19f   :  { %v256_v28 = vrot.slane %v255_v27, 1 }
 0x1a1   :  { %v257_v30 = vadd.f32 %v256_v28, %v255_v27 }
 0x1a3   :  { %v262_v31 = vadd.f32 %v260_v29, %v257_v30 }
 0x1a5   :  { %v263_v32 = vsub.f32 0.0, %v262_v31 }
 0x1a7   :  { %v264_v33 = vmul.f32 1.442695, %v263_v32  ;;  %v756_v32 = vmov 31  }
 0x1a8   :  { %740 = vset.pattern.permute.xlu0 %v756_v32 }
 0x1a9   :  { %743 = vpow2.f32 %v264_v33  ;;  %v757_v33 = vmov 32  }
 0x1aa   :  { %741 = vset.pattern.permute.xlu1 %v757_v33 }
 0x1b6   :  { %v744_v34 = vpop.eup %743 }
 0x1b7   :  { %v266_v35 = vadd.f32 1.0, %v744_v34 }
 0x1b9   :  { %745 = vrcp.f32 %v266_v35 }
 0x1c6   :  { %v746_v36 = vpop.eup %745 }
 0x1c7   :  { %334 = vmatmul.mubr.f32.vlgmr.msra.gmra.mxu1 %v746_v36  ;;  %405 = vmatmul.mubr.f32.vlgmr.msra.gmra.mxu0 %v746_v36 }
 0x1c8   :  { %547 = vmatprep.mubr.f32.mxu1 %v749_v0  ;;  %618 = vmatprep.mubr.f32.mxu0 %v749_v0  ;;  %v19_v0 = vld [vmem:[%s1055_s0 + $0x40] sm:$0xf] }
 0x287   :  { %v335_v43 = vpop.f32.mrf.mxu1  ;;  %v406_v44 = vpop.f32.mrf.mxu0 }
 0x288   :  { %v448_v46 = vrot.slane %v335_v43, %v447_v42  ;;  %v456_v50 = vrot.slane %v406_v44, %v447_v42 }
 0x289   :  { %v337_v48 = vpop.f32.mrf.mxu1  ;;  %v408_v49 = vpop.f32.mrf.mxu0 }
 0x28a   :  { %v415_v51 = vcombine.low %v335_v43, %v337_v48  ;;  %v452_v52 = vrot.slane %v337_v48, %v447_v42  ;;  %v416_v55 = vcombine.low %v406_v44, %v408_v49  ;;  %v460_v56 = vrot.slane %v408_v49, %v447_v42 }
 0x28b   :  { %v461_v59 = vmul.f32 %v448_v46, %v19_v0  ;;  %v463_v63 = vmul.f32 %v456_v50, %v21_v54 }
 0x28c   :  { %v423_v57 = vrot.slane %v415_v51, %v422_v45  ;;  %v462_v58 = vmul.f32 %v452_v52, %v20_v47  ;;  %v430_v60 = vrot.slane %v416_v55, %v422_v45  ;;  %v464_v61 = vmul.f32 %v460_v56, %v22_v53 }
 0x28e   :  { %693 = vmatprep.subr.msk.mxu1 %vm470_vm4, %v462_v58  ;;  %v431_v1 = vcombine.low %v423_v57, %v430_v60  ;;  %696 = vmatprep.subr.msk.mxu0 %vm470_vm4, %v464_v61 }
 0x28f   :  { %694 = vmatpush1.msk.msra.mxu1 %vm470_vm4, %v461_v59  ;;  %697 = vmatpush1.msk.msra.mxu0 %vm470_vm4, %v463_v63 }
 0x290   :  { %695 = vmatmul.mubr.msk.f32.vlgmr.msra.gmra.mxu1 %vm467_vm5, %v466_v62  ;;  %v438_v2 = vrot.slane %v431_v1, %v422_v45  ;;  %698 = vmatmul.mubr.msk.f32.vlgmr.msra.gmra.mxu0 %vm467_vm5, %v466_v62 }
 0x292   :  { %444 = vst.msk [vmem:[%s1057_s4] sm:$0xf] %vm442_vm6, %v438_v2 }
 0x350   :  { %v549_v3 = vpop.f32.mrf.mxu1  ;;  %v620_v4 = vpop.f32.mrf.mxu0 }
 0x351   :  { %v625_v7 = vsel %vm470_vm4, %v549_v3, 0.0  ;;  %v628_v11 = vsel %vm470_vm4, %v620_v4, 0.0 }
 0x352   :  { %v551_v5 = vpop.f32.mrf.mxu1  ;;  %v622_v10 = vpop.f32.mrf.mxu0 }
 0x353   :  { %v626_v8 = vsel %vm470_vm4, %v551_v5, 0.0  ;;  %v630_v13 = vsel %vm470_vm4, %v622_v10, 0.0 }
 0x354   :  { %v627_v9 = vadd.f32 %v626_v8, %v625_v7 }
 0x356   :  { %v629_v12 = vadd.f32 %v628_v11, %v627_v9 }
 0x358   :  { %v631_v14 = vadd.f32 %v630_v13, %v629_v12 }
 0x35a   :  { %632 = vadd.xlane.f32.xlu1 %v631_v14 }
 0x36b   :  { %666 = vperm.xlu1 %741, %v809_v6  }
 0x3e3   :  { %v633_v15 = vpop.xlane.xlu1 %632 }
 0x3e4   :  { %v634_v16 = vmul.f32 0.001953125, %v633_v15 }
 0x3e6   :  { %v635_v17 = vsub.f32 %v549_v3, %v634_v16  ;;  %v636_v18 = vsub.f32 %v551_v5, %v634_v16  ;;  %v637_v19 = vsub.f32 %v620_v4, %v634_v16  ;;  %v638_v20 = vsub.f32 %v622_v10, %v634_v16 }
 0x3e7   :  { %v667_v40 = vpop.permute.xlu1 %666 }
 0x3e8   :  { %v639_v21 = vmul.f32 %v635_v17, %v635_v17  ;;  %v640_v22 = vmul.f32 %v636_v18, %v636_v18  ;;  %v641_v23 = vmul.f32 %v637_v19, %v637_v19  ;;  %v642_v24 = vmul.f32 %v638_v20, %v638_v20 }
 0x3ea   :  { %v643_v25 = vsel %vm470_vm4, %v639_v21, 0.0  ;;  %v644_v26 = vsel %vm470_vm4, %v640_v22, 0.0  ;;  %v646_v28 = vsel %vm470_vm4, %v641_v23, 0.0  ;;  %v648_v30 = vsel %vm470_vm4, %v642_v24, 0.0 }
 0x3eb   :  { %v645_v27 = vadd.f32 %v644_v26, %v643_v25 }
 0x3ed   :  { %v647_v29 = vadd.f32 %v646_v28, %v645_v27 }
 0x3ef   :  { %v649_v31 = vadd.f32 %v648_v30, %v647_v29 }
 0x3f1   :  { %650 = vadd.xlane.f32.xlu0 %v649_v31 }
 0x47a   :  { %v651_v34 = vpop.xlane.xlu0 %650 }
 0x47b   :  { %v652_v35 = vmul.f32 0.001953125, %v651_v34 }
 0x47d   :  { %v653_v36 = vadd.f32 1e-05, %v652_v35 }
 0x47f   :  { %747 = vrsqrt.f32 %v653_v36 }
 0x48c   :  { %v748_v37 = vpop.eup %747 }
 0x48d   :  { %v655_v38 = vmul.f32 %v748_v37, %v809_v6 }
 0x48f   :  { %658 = vperm.xlu0 %740, %v655_v38  }
 0x493   :  { %742 = vset.pattern.permute.xlu0 %v757_v33 }
 0x50a   :  { %v659_v39 = vpop.permute.xlu0 %658 }
 0x50b   :  { %v661_v41 = vmul.f32 %v659_v39, %v635_v17  ;;  %v662_v42 = vmul.f32 %v659_v39, %v636_v18  ;;  %v663_v43 = vmul.f32 %v659_v39, %v637_v19  ;;  %v664_v44 = vmul.f32 %v659_v39, %v638_v20 }
 0x50d   :  { %v669_v45 = vadd.f32 %v667_v40, %v661_v41  ;;  %v670_v46 = vadd.f32 %v667_v40, %v662_v42  ;;  %v671_v47 = vadd.f32 %v667_v40, %v663_v43  ;;  %v672_v48 = vadd.f32 %v667_v40, %v664_v44 }
 0x50f   :  { %v677_v49 = vcombine.low %v669_v45, %v670_v46  ;;  %v678_v0 = vcombine.low %v671_v47, %v672_v48 }
 0x511   :  { %681 = vst [vmem:[%s1058_s3] sm:$0xff] %v677_v49  ;;  %682 = vst [vmem:[%s1058_s3 + $0x8] sm:$0xff] %v678_v0 }

</bundles_post_ra>
